<compile_context>
chip_gen: v7x
topology: tpu7x:2x2x1
jax: 0.10.0
libtpu: 0.0.40
codegen_flags: <defaults>
</compile_context>

<pallas_src>
import functools

import jax
import jax.numpy as jnp
from jax.experimental import pallas as pl
from jax.experimental.pallas import tpu as pltpu


def _round_up(v, m):
    return ((v + m - 1) // m) * m


def _logits_stats_kernel(x_ref, w_ref, logits_ref, pmax_ref, psum_ref, *,
                         n_valid, tile_n, feat, need_mask):
    """Pass 1: lane-dense logits + per-tile partial softmax stats.

    x_ref      : (tn, F)            f32/bf16 VMEM (one row tile, double-buffered)
    w_ref      : (1, F)             f32 VMEM      (weights, resident)
    logits_ref : (1, tn//128, 128)  f32           (dense logits for this tile)
    pmax_ref   : (1, 1, 1)          f32           (per-tile max)
    psum_ref   : (1, 1, 1)          f32           (per-tile sum of exp(z - max))
    """
    i = pl.program_id(0)
    g = tile_n // 128

    # Upcast (bf16 input supported) and regroup rows into (g, 128, F): the 128
    # rows land on the lane axis of z below, making all later work lane-dense.
    # The reshape only splits the sublane dim at multiples of 128, so no data
    # movement is required.
    xv = x_ref[...].astype(jnp.float32).reshape(g, 128, feat)
    wv = w_ref[...].astype(jnp.float32).reshape(1, 1, feat)

    # VPU broadcast multiply + XLU feature reduce -> lane-dense (g, 128).
    z = jnp.sum(xv * wv, axis=-1)
    # NOTE: bias intentionally omitted -- softmax over dim=0 is invariant to it.

    if need_mask:
        # Rows past n_valid (only in the last, partial tile) must contribute
        # exp(.) == 0 to the batch softmax; jnp.where also blocks any NaN from
        # the out-of-bounds garbage rows.
        rows = (i * tile_n
                + jax.lax.broadcasted_iota(jnp.int32, z.shape, 0) * 128
                + jax.lax.broadcasted_iota(jnp.int32, z.shape, 1))
        z = jnp.where(rows < n_valid, z, -jnp.inf)

    logits_ref[0] = z                                  # dense, unmasked store

    # Per-tile partial statistics; global combine happens in the wrapper so
    # this grid axis stays "parallel" (uses both TensorCores on v7x).
    m_t = jnp.max(z, keepdims=True)                    # (1, 1)
    pmax_ref[0] = m_t
    psum_ref[0] = jnp.sum(jnp.exp(z - m_t), keepdims=True)


def _normalize_kernel(m_ref, inv_l_ref, z_ref, o_ref):
    """Pass 2 (lane-dense): out = exp(z - m_global) * (1 / l_global)."""
    o_ref[...] = jnp.exp(z_ref[...] - m_ref[0, 0]) * inv_l_ref[0, 0]


# Per-pipeline-buffer byte budget for the x tile (double-buffered by Pallas).
_X_TILE_BUDGET_BYTES = 4 * 1024 * 1024
_MAX_TILE_N = 16384


def _pick_tile_n(n, f, itemsize):
    # VMEM rows are lane-padded to a multiple of 128, so budget on the padded F.
    f_pad = _round_up(max(f, 1), 128)
    rows = _X_TILE_BUDGET_BYTES // (itemsize * f_pad)
    tn = max(128, (rows // 128) * 128)
    tn = min(tn, _MAX_TILE_N)
    return min(tn, _round_up(n, 128))


@functools.partial(jax.jit, static_argnames=("tile_n",))
def logistic_regression_forward(x, weight, bias=None, *, tile_n=None):
    """softmax(x @ weight.T + bias, axis=0) with shape (N, 1).

    x: (N, F) float32 or bfloat16; weight: (1, F) (PyTorch Linear layout);
    bias: (1,) -- accepted for API parity but mathematically a no-op under the
    dim=0 softmax, so it is not used.
    """
    del bias
    n, f = x.shape
    if x.dtype not in (jnp.float32, jnp.bfloat16):
        x = x.astype(jnp.float32)
    w_row = weight.reshape(1, f).astype(jnp.float32)

    if tile_n is None:
        tn = _pick_tile_n(n, f, x.dtype.itemsize)
    else:
        # Clamp caller tile to a multiple of 128 (lane-dense row groups and
        # the (8,128) BlockSpec divisibility rule).
        tn = min(max(128, (int(tile_n) // 128) * 128), _round_up(n, 128))
    num_tiles = pl.cdiv(n, tn)
    n_pad = num_tiles * tn
    g = tn // 128

    # ---- Pass 1: dense logits + per-tile partial (max, sum-exp) ----
    kernel1 = functools.partial(_logits_stats_kernel, n_valid=n, tile_n=tn,
                                feat=f, need_mask=(n_pad != n))
    logits, pmax, psum = pl.pallas_call(
        kernel1,
        out_shape=(
            jax.ShapeDtypeStruct((num_tiles, g, 128), jnp.float32),
            jax.ShapeDtypeStruct((num_tiles, 1, 1), jnp.float32),
            jax.ShapeDtypeStruct((num_tiles, 1, 1), jnp.float32),
        ),
        grid=(num_tiles,),
        in_specs=[
            pl.BlockSpec((tn, f), lambda i: (i, 0)),          # x tile
            pl.BlockSpec((1, f), lambda i: (0, 0)),           # w (resident)
        ],
        out_specs=(
            pl.BlockSpec((1, g, 128), lambda i: (i, 0, 0)),   # dense logits
            pl.BlockSpec((1, 1, 1), lambda i: (i, 0, 0)),     # per-tile max
            pl.BlockSpec((1, 1, 1), lambda i: (i, 0, 0)),     # per-tile sumexp
        ),
        compiler_params=pltpu.CompilerParams(
            # No cross-iteration state -> may split across TensorCores (v7x).
            dimension_semantics=("parallel",),
            vmem_limit_bytes=32 * 1024 * 1024,
        ),
    )(x, w_row)

    # ---- Global combine (num_tiles scalars -> trivially cheap in XLA) ----
    pmax = pmax.reshape(num_tiles)
    psum = psum.reshape(num_tiles)
    m_g = jnp.max(pmax)
    l_g = jnp.sum(psum * jnp.exp(pmax - m_g))
    m_smem = m_g.reshape(1, 1)
    inv_l_smem = (1.0 / l_g).reshape(1, 1)      # exact divide, one scalar (free)

    # ---- Pass 2: lane-dense normalize over (n_pad//128, 128) blocks ----
    rows_total = n_pad // 128
    logits2d = logits.reshape(rows_total, 128)  # free row-major reshape
    if rows_total <= 32:
        r_tile = rows_total                     # single/full block, still dense
    else:
        # >= 4 grid steps (double buffering + 2-TC sharding on v7x),
        # <= 1 MiB per pipeline buffer, multiple of 8 sublanes.
        r_tile = min(2048, max(8, ((rows_total // 4) // 8) * 8))

    probs2d = pl.pallas_call(
        _normalize_kernel,
        out_shape=jax.ShapeDtypeStruct((rows_total, 128), jnp.float32),
        grid=(pl.cdiv(rows_total, r_tile),),
        in_specs=[
            pl.BlockSpec(memory_space=pltpu.MemorySpace.SMEM),   # global max
            pl.BlockSpec(memory_space=pltpu.MemorySpace.SMEM),   # 1 / sum-exp
            pl.BlockSpec((r_tile, 128), lambda i: (i, 0)),       # dense logits
        ],
        out_specs=pl.BlockSpec((r_tile, 128), lambda i: (i, 0)),
        compiler_params=pltpu.CompilerParams(
            dimension_semantics=("parallel",),
            vmem_limit_bytes=32 * 1024 * 1024,
        ),
    )(m_smem, inv_l_smem, logits2d)

    # Back to the PyTorch output shape (N, 1); padded rows are dropped.
    return probs2d.reshape(n_pad, 1)[:n]


if __name__ == "__main__":
    # Small shapes consistent with the module: N samples of n_features feeding
    # Linear(n_features, 1) followed by softmax over dim=0 (the batch axis).
    N, F = 300, 32
    key = jax.random.PRNGKey(0)
    kx, kw, kb = jax.random.split(key, 3)

    x = jax.random.normal(kx, (N, F), dtype=jnp.float32)

    # torch.nn.Linear default init: U(-1/sqrt(F), 1/sqrt(F))
    bound = 1.0 / (F ** 0.5)
    weight = jax.random.uniform(kw, (1, F), minval=-bound, maxval=bound,
                                dtype=jnp.float32)
    bias = jax.random.uniform(kb, (1,), minval=-bound, maxval=bound,
                              dtype=jnp.float32)

    # Reference: same math as the PyTorch module, in plain JAX.
    ref = jax.nn.softmax(x @ weight.T + bias, axis=0)

    # 1) auto tile size (single tile at this problem size)
    out_auto = jax.block_until_ready(
        logistic_regression_forward(x, weight, bias))
    # 2) forced 128-row tiles -> multi-step grid + partial-tile masking path
    out_tiled = jax.block_until_ready(
        logistic_regression_forward(x, weight, bias, tile_n=128))

    for out in (out_auto, out_tiled):
        assert out.shape == (N, 1)
        assert bool(jnp.allclose(out, ref, atol=1e-6, rtol=1e-4)), (
            float(jnp.max(jnp.abs(out - ref))))
        assert bool(jnp.allclose(jnp.sum(out), 1.0, atol=1e-3))

    # Optional bf16-x path (halves pass-1 HBM read traffic); looser tolerance.
    out_bf16 = jax.block_until_ready(
        logistic_regression_forward(x.astype(jnp.bfloat16), weight, bias))
    assert out_bf16.shape == (N, 1)
    assert bool(jnp.allclose(out_bf16, ref, atol=1e-4, rtol=5e-2))

    print("KERNEL_OK")
</pallas_src>

<mosaic_0001>
module attributes {stable_mosaic.version = 11 : i64} {
  func.func @_logits_stats_kernel(%arg0: i32, %arg1: memref<384x32xf32, #tpu.memory_space<vmem>>, %arg2: memref<1x32xf32, #tpu.memory_space<vmem>>, %arg3: memref<1x3x128xf32, #tpu.memory_space<vmem>>, %arg4: memref<1x1x1xf32, #tpu.memory_space<vmem>>, %arg5: memref<1x1x1xf32, #tpu.memory_space<vmem>>) attributes {dimension_semantics = [#tpu.dimension_semantics<parallel>], iteration_bounds = array<i64: 1>, scalar_prefetch = 0 : i64, scratch_operands = 0 : i64, tpu.core_type = #tpu.core_type<tc>, window_params = [{transform_indices = @transform_0, window_bounds = array<i64: 384, 32>}, {pipeline_mode = #tpu.pipeline_mode<synchronous>, transform_indices = @transform_1, window_bounds = array<i64: 1, 32>}, {transform_indices = @transform_2, window_bounds = array<i64: 1, 3, 128>}, {transform_indices = @transform_3, window_bounds = array<i64: 1, 1, 1>}, {transform_indices = @transform_4, window_bounds = array<i64: 1, 1, 1>}]} {
    %c0 = arith.constant 0 : index
    %c0_0 = arith.constant 0 : index
    %0 = vector.load %arg1[%c0, %c0_0] : memref<384x32xf32, #tpu.memory_space<vmem>>, vector<384x32xf32>
    %1 = vector.shape_cast %0 : vector<384x32xf32> to vector<3x128x32xf32>
    %c0_1 = arith.constant 0 : index
    %c0_2 = arith.constant 0 : index
    %2 = vector.load %arg2[%c0_1, %c0_2] : memref<1x32xf32, #tpu.memory_space<vmem>>, vector<1x32xf32>
    %3 = vector.shape_cast %2 : vector<1x32xf32> to vector<1x1x32xf32>
    %4 = vector.broadcast %3 : vector<1x1x32xf32> to vector<3x128x32xf32>
    %5 = arith.mulf %1, %4 : vector<3x128x32xf32>
    %cst = arith.constant dense<0.000000e+00> : vector<3x128xf32>
    %6 = vector.multi_reduction <add>, %5, %cst [2] : vector<3x128x32xf32> to vector<3x128xf32>
    %c384_i32 = arith.constant 384 : i32
    %7 = arith.muli %arg0, %c384_i32 : i32
    %8 = tpu.iota {dimensions = array<i32: 0>} : vector<3x128xi32>
    %c128_i32 = arith.constant 128 : i32
    %9 = vector.broadcast %c128_i32 : i32 to vector<3x128xi32>
    %10 = arith.muli %8, %9 : vector<3x128xi32>
    %11 = vector.broadcast %7 : i32 to vector<3x128xi32>
    %12 = arith.addi %11, %10 : vector<3x128xi32>
    %13 = tpu.iota {dimensions = array<i32: 1>} : vector<3x128xi32>
    %14 = arith.addi %12, %13 : vector<3x128xi32>
    %c300_i32 = arith.constant 300 : i32
    %15 = vector.broadcast %c300_i32 : i32 to vector<3x128xi32>
    %16 = arith.cmpi slt, %14, %15 : vector<3x128xi32>
    %cst_3 = arith.constant 0xFF800000 : f32
    %17 = vector.broadcast %cst_3 : f32 to vector<3x128xf32>
    %18 = arith.select %16, %6, %17 : vector<3x128xi1>, vector<3x128xf32>
    %c0_4 = arith.constant 0 : index
    %c0_5 = arith.constant 0 : index
    %c0_6 = arith.constant 0 : index
    %19 = vector.load %arg3[%c0_4, %c0_5, %c0_6] : memref<1x3x128xf32, #tpu.memory_space<vmem>>, vector<1x3x128xf32>
    %20 = vector.shape_cast %19 : vector<1x3x128xf32> to vector<3x128xf32>
    %21 = vector.shape_cast %18 : vector<3x128xf32> to vector<1x3x128xf32>
    tpu.vector_store %arg3[%c0_4, %c0_5, %c0_6], %21 {strides = array<i32>} : memref<1x3x128xf32, #tpu.memory_space<vmem>>, vector<1x3x128xf32>,
    %22 = vector.shape_cast %18 : vector<3x128xf32> to vector<1x3x128xf32>
    %cst_7 = arith.constant dense<0xFF800000> : vector<1xf32>
    %23 = vector.multi_reduction <maximumf>, %22, %cst_7 [1, 2] : vector<1x3x128xf32> to vector<1xf32>
    %24 = vector.shape_cast %23 : vector<1xf32> to vector<1x1x1xf32>
    %25 = vector.extract %24[0, 0, 0] : f32 from vector<1x1x1xf32>
    %26 = vector.broadcast %25 : f32 to vector<1x1xf32>
    %c0_8 = arith.constant 0 : index
    %c0_9 = arith.constant 0 : index
    %c0_10 = arith.constant 0 : index
    %27 = vector.load %arg4[%c0_8, %c0_9, %c0_10] : memref<1x1x1xf32, #tpu.memory_space<vmem>>, vector<1x1x1xf32>
    %28 = vector.shape_cast %27 : vector<1x1x1xf32> to vector<1x1xf32>
    %29 = vector.shape_cast %26 : vector<1x1xf32> to vector<1x1x1xf32>
    tpu.vector_store %arg4[%c0_8, %c0_9, %c0_10], %29 {strides = array<i32>} : memref<1x1x1xf32, #tpu.memory_space<vmem>>, vector<1x1x1xf32>,
    %30 = vector.broadcast %26 : vector<1x1xf32> to vector<3x128xf32>
    %31 = arith.subf %18, %30 : vector<3x128xf32>
    %32 = math.exp %31 : vector<3x128xf32>
    %33 = vector.shape_cast %32 : vector<3x128xf32> to vector<1x3x128xf32>
    %cst_11 = arith.constant dense<0.000000e+00> : vector<1xf32>
    %34 = vector.multi_reduction <add>, %33, %cst_11 [1, 2] : vector<1x3x128xf32> to vector<1xf32>
    %35 = vector.shape_cast %34 : vector<1xf32> to vector<1x1x1xf32>
    %36 = vector.extract %35[0, 0, 0] : f32 from vector<1x1x1xf32>
    %37 = vector.broadcast %36 : f32 to vector<1x1xf32>
    %c0_12 = arith.constant 0 : index
    %c0_13 = arith.constant 0 : index
    %c0_14 = arith.constant 0 : index
    %38 = vector.load %arg5[%c0_12, %c0_13, %c0_14] : memref<1x1x1xf32, #tpu.memory_space<vmem>>, vector<1x1x1xf32>
    %39 = vector.shape_cast %38 : vector<1x1x1xf32> to vector<1x1xf32>
    %40 = vector.shape_cast %37 : vector<1x1xf32> to vector<1x1x1xf32>
    tpu.vector_store %arg5[%c0_12, %c0_13, %c0_14], %40 {strides = array<i32>} : memref<1x1x1xf32, #tpu.memory_space<vmem>>, vector<1x1x1xf32>,
    return
  }
  func.func @transform_0(%arg0: i32) -> (i32, i32) {
    %c0_i32 = arith.constant 0 : i32
    %c0_i32_0 = arith.constant 0 : i32
    return %arg0, %c0_i32 : i32, i32
  }
  func.func @transform_1(%arg0: i32) -> (i32, i32) {
    %c0_i32 = arith.constant 0 : i32
    %c0_i32_0 = arith.constant 0 : i32
    %c0_i32_1 = arith.constant 0 : i32
    return %c0_i32, %c0_i32_0 : i32, i32
  }
  func.func @transform_2(%arg0: i32) -> (i32, i32, i32) {
    %c0_i32 = arith.constant 0 : i32
    %c0_i32_0 = arith.constant 0 : i32
    %c0_i32_1 = arith.constant 0 : i32
    return %arg0, %c0_i32, %c0_i32_0 : i32, i32, i32
  }
  func.func @transform_3(%arg0: i32) -> (i32, i32, i32) {
    %c0_i32 = arith.constant 0 : i32
    %c0_i32_0 = arith.constant 0 : i32
    %c0_i32_1 = arith.constant 0 : i32
    return %arg0, %c0_i32, %c0_i32_0 : i32, i32, i32
  }
  func.func @transform_4(%arg0: i32) -> (i32, i32, i32) {
    %c0_i32 = arith.constant 0 : i32
    %c0_i32_0 = arith.constant 0 : i32
    %c0_i32_1 = arith.constant 0 : i32
    return %arg0, %c0_i32, %c0_i32_0 : i32, i32, i32
  }
}

module attributes {stable_mosaic.version = 11 : i64} {
  func.func @_normalize_kernel(%arg0: i32, %arg1: memref<1x1xf32, #tpu.memory_space<smem>>, %arg2: memref<1x1xf32, #tpu.memory_space<smem>>, %arg3: memref<3x128xf32, #tpu.memory_space<vmem>>, %arg4: memref<3x128xf32, #tpu.memory_space<vmem>>) attributes {dimension_semantics = [#tpu.dimension_semantics<parallel>], iteration_bounds = array<i64: 1>, scalar_prefetch = 0 : i64, scratch_operands = 0 : i64, tpu.core_type = #tpu.core_type<tc>, window_params = [{transform_indices = @transform_0, window_bounds = array<i64: 1, 1>}, {transform_indices = @transform_1, window_bounds = array<i64: 1, 1>}, {transform_indices = @transform_2, window_bounds = array<i64: 3, 128>}, {transform_indices = @transform_3, window_bounds = array<i64: 3, 128>}]} {
    %c0 = arith.constant 0 : index
    %c0_0 = arith.constant 0 : index
    %0 = vector.load %arg3[%c0, %c0_0] : memref<3x128xf32, #tpu.memory_space<vmem>>, vector<3x128xf32>
    %c0_1 = arith.constant 0 : index
    %c0_2 = arith.constant 0 : index
    %1 = memref.load %arg1[%c0_1, %c0_2] : memref<1x1xf32, #tpu.memory_space<smem>>
    %2 = vector.broadcast %1 : f32 to vector<3x128xf32>
    %3 = arith.subf %0, %2 : vector<3x128xf32>
    %4 = math.exp %3 : vector<3x128xf32>
    %c0_3 = arith.constant 0 : index
    %c0_4 = arith.constant 0 : index
    %5 = memref.load %arg2[%c0_3, %c0_4] : memref<1x1xf32, #tpu.memory_space<smem>>
    %6 = vector.broadcast %5 : f32 to vector<3x128xf32>
    %7 = arith.mulf %4, %6 : vector<3x128xf32>
    %c0_5 = arith.constant 0 : index
    %c0_6 = arith.constant 0 : index
    %8 = vector.load %arg4[%c0_5, %c0_6] : memref<3x128xf32, #tpu.memory_space<vmem>>, vector<3x128xf32>
    tpu.vector_store %arg4[%c0_5, %c0_6], %7 {strides = array<i32>} : memref<3x128xf32, #tpu.memory_space<vmem>>, vector<3x128xf32>,
    return
  }
  func.func @transform_0(%arg0: i32) -> (i32, i32) {
    %c0_i32 = arith.constant 0 : i32
    %c0_i32_0 = arith.constant 0 : i32
    %c0_i32_1 = arith.constant 0 : i32
    return %c0_i32, %c0_i32_0 : i32, i32
  }
  func.func @transform_1(%arg0: i32) -> (i32, i32) {
    %c0_i32 = arith.constant 0 : i32
    %c0_i32_0 = arith.constant 0 : i32
    %c0_i32_1 = arith.constant 0 : i32
    return %c0_i32, %c0_i32_0 : i32, i32
  }
  func.func @transform_2(%arg0: i32) -> (i32, i32) {
    %c0_i32 = arith.constant 0 : i32
    %c0_i32_0 = arith.constant 0 : i32
    return %arg0, %c0_i32 : i32, i32
  }
  func.func @transform_3(%arg0: i32) -> (i32, i32) {
    %c0_i32 = arith.constant 0 : i32
    %c0_i32_0 = arith.constant 0 : i32
    return %arg0, %c0_i32 : i32, i32
  }
}

</mosaic_0001>

<bundles_post_ra>
// kernel: logistic_regression_forward.3
= control target key start
LH: loop header
LB: loop body
LE: loop exit
PB: predicated region body
PF: predicated region fallthrough
CT: control target
= control target key end

     0   :  { %s64_s0 = inlined_call_operand.<no memory space> [shape: f32[1,1], index: 0, kind: input, shape index: {}]   ;;  %s65_s2 = inlined_call_operand.vmem [shape: f32[3,128], index: 2, kind: input, shape index: {}]   ;;  %s66_s1 = inlined_call_operand.<no memory space> [shape: f32[1,1], index: 1, kind: input, shape index: {}]   ;;  %s67_s3 = inlined_call_operand.vmem [shape: f32[3,128], index: 3, kind: output, shape index: {}]  }
   0x1   :  { %v16_v0 = vld [vmem:[%s65_s2] sm:$0x7]  ;;  %v18_v1 = vstv %s64_s0  ;;  %v23_v4 = vstv %s66_s1 }
   0x2   :  { %v19_v2 = vsub.f32 %v16_v0, %v18_v1 }
   0x4   :  { %v20_v3 = vmul.f32 1.442695, %v19_v2 }
   0x6   :  { %30 = vpow2.f32 %v20_v3 }
  0x10   :  { %v31_v5 = vpop.eup %30 }
  0x11   :  { %v24_v6 = vmul.f32 %v31_v5, %v23_v4 }
  0x13   :  { %25 = vst [vmem:[%s67_s3] sm:$0x7] %v24_v6 }

// kernel: logistic_regression_forward.2
= control target key start
LH: loop header
LB: loop body
LE: loop exit
PB: predicated region body
PF: predicated region fallthrough
CT: control target
= control target key end

     0   :  { %10 = vsyncpa [#allocation3], 0  ;;  %vm119_vm0 = vcmask 261120   ;;  %s1317_s0 = inlined_call_operand.vmem [shape: f32[300,32], index: 0, kind: input, shape index: {}]   ;;  %s1318_s1 = inlined_call_operand.vmem [shape: f32[1,32], index: 1, kind: input, shape index: {}]   ;;  %s1319_s2 = inlined_call_operand.vmem [shape: f32[1,3,128], index: 2, kind: output, shape index: {0}]   ;;  %s1320_s3 = inlined_call_operand.hbm [shape: f32[1,1,1], index: 3, kind: output, shape index: {1}]   ;;  %s1321_s4 = inlined_call_operand.hbm [shape: f32[1,1,1], index: 4, kind: output, shape index: {2}]  }
   0x1   :  { %v32_v0 = vld [vmem:[%s1317_s0 + $0x80] sm:$0xff]  ;;  %v33_v5 = vld [vmem:[%s1317_s0 + $0x88] sm:$0xff]  ;;  %v34_v9 = vld [vmem:[%s1317_s0 + $0x90] sm:$0xff] }
   0x2   :  { %v747_v1 = vld [vmem:[%s1318_s1] ss:$0 sm:$0xff]  ;;  %v17_v6 = vld [vmem:[%s1317_s0 + $0x8] sm:$0xff]  ;;  %v18_v10 = vld [vmem:[%s1317_s0 + $0x10] sm:$0xff] }
   0x3   :  { %v16_v2 = vld [vmem:[%s1317_s0] sm:$0xff]  ;;  %v87_v3 = vmul.f32 %v747_v1, %v32_v0  ;;  %v88_v7 = vmul.f32 %v747_v1, %v33_v5  ;;  %v72_v8 = vmul.f32 %v747_v1, %v17_v6  ;;  %v89_v15 = vmul.f32 %v747_v1, %v34_v9  ;;  %v49_v17 = vld [vmem:[%s1317_s0 + $0x108] sm:$0xff]  ;;  %v35_v23 = vld [vmem:[%s1317_s0 + $0x98] sm:$0xff] }
   0x4   :  { %v71_v4 = vmul.f32 %v747_v1, %v16_v2  ;;  %v73_v16 = vmul.f32 %v747_v1, %v18_v10  ;;  %v48_v18 = vld [vmem:[%s1317_s0 + $0x100] sm:$0xff]  ;;  %v104_v21 = vmul.f32 %v747_v1, %v49_v17  ;;  %v19_v24 = vld [vmem:[%s1317_s0 + $0x18] sm:$0xff]  ;;  %v50_v26 = vld [vmem:[%s1317_s0 + $0x110] sm:$0xff]  ;;  %v90_v28 = vmul.f32 %v747_v1, %v35_v23 }
   0x5   :  { %v168_v11 = vsel %vm119_vm0, %v87_v3, 0.0  ;;  %v171_v13 = vsel %vm119_vm0, %v88_v7, 0.0  ;;  %v123_v14 = vsel %vm119_vm0, %v72_v8, 0.0  ;;  %v174_v19 = vsel %vm119_vm0, %v89_v15, 0.0  ;;  %v20_v25 = vld [vmem:[%s1317_s0 + $0x20] sm:$0xff]  ;;  %v51_v27 = vld [vmem:[%s1317_s0 + $0x118] sm:$0xff] }
   0x6   :  { %v120_v12 = vsel %vm119_vm0, %v71_v4, 0.0  ;;  %169 = vadd.xlane.f32.xlu1 %v168_v11  ;;  %v126_v20 = vsel %vm119_vm0, %v73_v16, 0.0  ;;  %v103_v22 = vmul.f32 %v747_v1, %v48_v18  ;;  %v74_v29 = vmul.f32 %v747_v1, %v19_v24  ;;  %v36_v34 = vld [vmem:[%s1317_s0 + $0xa0] sm:$0xff]  ;;  %v37_v35 = vld [vmem:[%s1317_s0 + $0xa8] sm:$0xff]  ;;  %v43_v37 = vld [vmem:[%s1317_s0 + $0xd8] sm:$0xff] }
   0x7   :  { %121 = vadd.xlane.f32.xlu0 %v120_v12  ;;  %v219_v30 = vsel %vm119_vm0, %v104_v21, 0.0  ;;  %v75_v32 = vmul.f32 %v747_v1, %v20_v25  ;;  %v105_v33 = vmul.f32 %v747_v1, %v50_v26  ;;  %v106_v36 = vmul.f32 %v747_v1, %v51_v27  ;;  %v27_v38 = vld [vmem:[%s1317_s0 + $0x58] sm:$0xff]  ;;  %v28_v39 = vld [vmem:[%s1317_s0 + $0x60] sm:$0xff]  ;;  %v58_v40 = vld [vmem:[%s1317_s0 + $0x150] sm:$0xff] }
   0x8   :  { %v216_v31 = vsel %vm119_vm0, %v103_v22, 0.0  ;;  %v59_v41 = vld [vmem:[%s1317_s0 + $0x158] sm:$0xff]  ;;  %v177_v42 = vsel %vm119_vm0, %v90_v28, 0.0  ;;  %v129_v43 = vsel %vm119_vm0, %v74_v29, 0.0  ;;  %v91_v44 = vmul.f32 %v747_v1, %v36_v34  ;;  %v44_v46 = vld [vmem:[%s1317_s0 + $0xe0] sm:$0xff]  ;;  %v45_v47 = vld [vmem:[%s1317_s0 + $0xe8] sm:$0xff] }
   0x9   :  { %v92_v45 = vmul.f32 %v747_v1, %v37_v35 }
   0xa   :  { %172 = vadd.xlane.f32.xlu1 %v171_v13 }
   0xb   :  { %124 = vadd.xlane.f32.xlu0 %v123_v14 }
   0xe   :  { %175 = vadd.xlane.f32.xlu1 %v174_v19 }
   0xf   :  { %127 = vadd.xlane.f32.xlu0 %v126_v20 }
  0x12   :  { %220 = vadd.xlane.f32.xlu1 %v219_v30 }
  0x13   :  { %217 = vadd.xlane.f32.xlu0 %v216_v31 }
  0x14   :  { %11 = vsyncpa [#allocation5], 0  ;;  %v132_v48 = vsel %vm119_vm0, %v75_v32, 0.0  ;;  %v222_v49 = vsel %vm119_vm0, %v105_v33, 0.0  ;;  %v98_v50 = vmul.f32 %v747_v1, %v43_v37  ;;  %v82_v51 = vmul.f32 %v747_v1, %v27_v38  ;;  %v29_v52 = vld [vmem:[%s1317_s0 + $0x68] sm:$0xff]  ;;  %v30_v57 = vld [vmem:[%s1317_s0 + $0x70] sm:$0xff] }
  0x15   :  { %v225_v53 = vsel %vm119_vm0, %v106_v36, 0.0  ;;  %v83_v54 = vmul.f32 %v747_v1, %v28_v39  ;;  %v113_v55 = vmul.f32 %v747_v1, %v58_v40  ;;  %v114_v56 = vmul.f32 %v747_v1, %v59_v41  ;;  %v60_v58 = vld [vmem:[%s1317_s0 + $0x160] sm:$0xff]  ;;  %v61_v63 = vld [vmem:[%s1317_s0 + $0x168] sm:$0xff]  ;;  %v46_v0 = vld [vmem:[%s1317_s0 + $0xf0] sm:$0xff] }
  0x16   :  { %v855_v59 = vsel %vm119_vm0, %v98_v50, 0.0  ;;  %v858_v60 = vsel %vm119_vm0, %v82_v51, 0.0  ;;  %v99_v61 = vmul.f32 %v747_v1, %v44_v46  ;;  %v100_v62 = vmul.f32 %v747_v1, %v45_v47  ;;  %v47_v2 = vld [vmem:[%s1317_s0 + $0xf8] sm:$0xff]  ;;  %178 = vadd.xlane.f32.xlu1 %v177_v42  ;;  %v62_v8 = vld [vmem:[%s1317_s0 + $0x170] sm:$0xff]  ;;  %v21_v14 = vld [vmem:[%s1317_s0 + $0x28] sm:$0xff] }
  0x17   :  { %130 = vadd.xlane.f32.xlu0 %v129_v43  ;;  %v872_v3 = vsel %vm119_vm0, %v83_v54, 0.0  ;;  %v875_v4 = vsel %vm119_vm0, %v113_v55, 0.0  ;;  %v878_v5 = vsel %vm119_vm0, %v114_v56, 0.0  ;;  %v84_v6 = vmul.f32 %v747_v1, %v29_v52  ;;  %v31_v7 = vld [vmem:[%s1317_s0 + $0x78] sm:$0xff]  ;;  %v22_v31 = vld [vmem:[%s1317_s0 + $0x30] sm:$0xff]  ;;  %v52_v32 = vld [vmem:[%s1317_s0 + $0x120] sm:$0xff] }
  0x18   :  { %v888_v9 = vsel %vm119_vm0, %v99_v61, 0.0  ;;  %v891_v10 = vsel %vm119_vm0, %v100_v62, 0.0  ;;  %v85_v11 = vmul.f32 %v747_v1, %v30_v57  ;;  %v115_v12 = vmul.f32 %v747_v1, %v60_v58  ;;  %v63_v13 = vld [vmem:[%s1317_s0 + $0x178] sm:$0xff]  ;;  %v53_v38 = vld [vmem:[%s1317_s0 + $0x128] sm:$0xff]  ;;  %v38_v39 = vld [vmem:[%s1317_s0 + $0xb0] sm:$0xff] }
  0x19   :  { %v902_v15 = vsel %vm119_vm0, %v84_v6, 0.0  ;;  %v116_v16 = vmul.f32 %v747_v1, %v61_v63  ;;  %v101_v17 = vmul.f32 %v747_v1, %v46_v0  ;;  %v102_v18 = vmul.f32 %v747_v1, %v47_v2  ;;  %v24_v50 = vld [vmem:[%s1317_s0 + $0x40] sm:$0xff]  ;;  %v54_v51 = vld [vmem:[%s1317_s0 + $0x130] sm:$0xff]  ;;  %v55_v56 = vld [vmem:[%s1317_s0 + $0x138] sm:$0xff] }
  0x1a   :  { %v908_v19 = vsel %vm119_vm0, %v85_v11, 0.0  ;;  %v911_v20 = vsel %vm119_vm0, %v115_v12, 0.0  ;;  %v86_v21 = vmul.f32 %v747_v1, %v31_v7  ;;  %v117_v22 = vmul.f32 %v747_v1, %v62_v8  ;;  %133 = vadd.xlane.f32.xlu1 %v132_v48  ;;  %v40_v57 = vld [vmem:[%s1317_s0 + $0xc0] sm:$0xff]  ;;  %v41_v0 = vld [vmem:[%s1317_s0 + $0xc8] sm:$0xff]  ;;  %v26_v12 = vld [vmem:[%s1317_s0 + $0x50] sm:$0xff] }
  0x1b   :  { %223 = vadd.xlane.f32.xlu0 %v222_v49  ;;  %v916_v23 = vsel %vm119_vm0, %v116_v16, 0.0  ;;  %v919_v24 = vsel %vm119_vm0, %v101_v17, 0.0  ;;  %v922_v25 = vsel %vm119_vm0, %v102_v18, 0.0  ;;  %v118_v26 = vmul.f32 %v747_v1, %v63_v13  ;;  %v25_v2 = vld [vmem:[%s1317_s0 + $0x48] sm:$0xff]  ;;  %v56_v13 = vld [vmem:[%s1317_s0 + $0x140] sm:$0xff] }
  0x1c   :  { %v180_v27 = vsel %vm119_vm0, %v91_v44, 0.0  ;;  %v76_v28 = vmul.f32 %v747_v1, %v21_v14  ;;  %v928_v29 = vsel %vm119_vm0, %v86_v21, 0.0  ;;  %v931_v30 = vsel %vm119_vm0, %v117_v22, 0.0  ;;  %v39_v44 = vld [vmem:[%s1317_s0 + $0xb8] sm:$0xff]  ;;  %v57_v21 = vld [vmem:[%s1317_s0 + $0x148] sm:$0xff]  ;;  %v42_v22 = vld [vmem:[%s1317_s0 + $0xd0] sm:$0xff] }
  0x1d   :  { %v940_v33 = vsel %vm119_vm0, %v118_v26, 0.0  ;;  %v183_v34 = vsel %vm119_vm0, %v92_v45, 0.0  ;;  %v77_v36 = vmul.f32 %v747_v1, %v22_v31  ;;  %v107_v37 = vmul.f32 %v747_v1, %v52_v32  ;;  %v23_v45 = vld [vmem:[%s1317_s0 + $0x38] sm:$0xff] }
  0x1e   :  { %226 = vadd.xlane.f32.xlu1 %v225_v53  ;;  %v135_v35 = vsel %vm119_vm0, %v76_v28, 0.0  ;;  %v108_v42 = vmul.f32 %v747_v1, %v53_v38  ;;  %v93_v43 = vmul.f32 %v747_v1, %v38_v39  ;;  %v94_v48 = vmul.f32 %v747_v1, %v39_v44 }
  0x1f   :  { %181 = vadd.xlane.f32.xlu0 %v180_v27  ;;  %v138_v40 = vsel %vm119_vm0, %v77_v36, 0.0  ;;  %v228_v41 = vsel %vm119_vm0, %v107_v37, 0.0  ;;  %v78_v49 = vmul.f32 %v747_v1, %v23_v45  ;;  %v79_v54 = vmul.f32 %v747_v1, %v24_v50 }
  0x20   :  { %v231_v46 = vsel %vm119_vm0, %v108_v42, 0.0  ;;  %v186_v47 = vsel %vm119_vm0, %v93_v43, 0.0  ;;  %v189_v52 = vsel %vm119_vm0, %v94_v48, 0.0  ;;  %v109_v55 = vmul.f32 %v747_v1, %v54_v51 }
  0x21   :  { %v141_v53 = vsel %vm119_vm0, %v78_v49, 0.0  ;;  %v144_v58 = vsel %vm119_vm0, %v79_v54, 0.0  ;;  %v110_v62 = vmul.f32 %v747_v1, %v55_v56  ;;  %v95_v63 = vmul.f32 %v747_v1, %v40_v57 }
  0x22   :  { %184 = vadd.xlane.f32.xlu1 %v183_v34  ;;  %v234_v61 = vsel %vm119_vm0, %v109_v55, 0.0  ;;  %v96_v8 = vmul.f32 %v747_v1, %v41_v0  ;;  %v80_v11 = vmul.f32 %v747_v1, %v25_v2  ;;  %v81_v17 = vmul.f32 %v747_v1, %v26_v12 }
  0x23   :  { %136 = vadd.xlane.f32.xlu0 %v135_v35  ;;  %v237_v6 = vsel %vm119_vm0, %v110_v62, 0.0  ;;  %v192_v7 = vsel %vm119_vm0, %v95_v63, 0.0  ;;  %v111_v18 = vmul.f32 %v747_v1, %v56_v13  ;;  %v112_v28 = vmul.f32 %v747_v1, %v57_v21 }
  0x24   :  { %v195_v14 = vsel %vm119_vm0, %v96_v8, 0.0  ;;  %v147_v16 = vsel %vm119_vm0, %v80_v11, 0.0  ;;  %v150_v26 = vsel %vm119_vm0, %v81_v17, 0.0  ;;  %v97_v31 = vmul.f32 %v747_v1, %v42_v22 }
  0x25   :  { %v240_v27 = vsel %vm119_vm0, %v111_v18, 0.0  ;;  %v243_v32 = vsel %vm119_vm0, %v112_v28, 0.0  ;;  %v265_v1 = vlaneseq  ;;  %vm331_vm1 = vcmask 130112  }
  0x26   :  { %139 = vadd.xlane.f32.xlu1 %v138_v40  ;;  %v198_v34 = vsel %vm119_vm0, %v97_v31, 0.0  ;;  %vm338_vm2 = vcmask 195712   ;;  %vm345_vm3 = vcmask 261312   ;;  %vm352_vm4 = vcmask 326912  }
  0x27   :  { %229 = vadd.xlane.f32.xlu0 %v228_v41  ;;  %vm359_vm5 = vcmask 392512   ;;  %vm366_vm6 = vcmask 458112   ;;  %vm373_vm7 = vcmask 523712   ;;  %vm380_vm8 = vcmask 589312  }
  0x28   :  { %vm387_vm9 = vcmask 654912   ;;  %vm394_vm10 = vcmask 720512   ;;  %vm401_vm11 = vcmask 786112   ;;  %vm408_vm12 = vcmask 851712  }
  0x29   :  { %vm415_vm13 = vcmask 917312   ;;  %vm422_vm14 = vcmask 982912   ;;  %vm429_vm15 = vcmask 1048512   ;;  %vm589_vm0 = vcmask 1041409  }
  0x2a   :  { %232 = vadd.xlane.f32.xlu1 %v231_v46 }
  0x2b   :  { %187 = vadd.xlane.f32.xlu0 %v186_v47 }
  0x2e   :  { %190 = vadd.xlane.f32.xlu1 %v189_v52 }
  0x2f   :  { %142 = vadd.xlane.f32.xlu0 %v141_v53 }
  0x32   :  { %145 = vadd.xlane.f32.xlu1 %v144_v58 }
  0x33   :  { %235 = vadd.xlane.f32.xlu0 %v234_v61 }
  0x36   :  { %238 = vadd.xlane.f32.xlu1 %v237_v6 }
  0x37   :  { %193 = vadd.xlane.f32.xlu0 %v192_v7 }
  0x3a   :  { %196 = vadd.xlane.f32.xlu1 %v195_v14 }
  0x3b   :  { %148 = vadd.xlane.f32.xlu0 %v147_v16 }
  0x3e   :  { %151 = vadd.xlane.f32.xlu1 %v150_v26 }
  0x3f   :  { %241 = vadd.xlane.f32.xlu0 %v240_v27 }
  0x42   :  { %244 = vadd.xlane.f32.xlu1 %v243_v32 }
  0x43   :  { %199 = vadd.xlane.f32.xlu0 %v198_v34 }
  0x46   :  { %202 = vadd.xlane.f32.xlu1 %v855_v59  ;;  %v1034_v59 = vand.u32 127, %v265_v1 }
  0x47   :  { %154 = vadd.xlane.f32.xlu0 %v858_v60  ;;  %v1036_v60 = vshrl.u32 %v265_v1, 7 }
  0x48   :  { %v340_v40 = vadd.s32 4294967272, %v1034_v59  ;;  %v347_v22 = vadd.s32 4294967264, %v1034_v59  ;;  %v354_v26 = vadd.s32 4294967256, %v1034_v59  ;;  %v361_v31 = vadd.s32 4294967248, %v1034_v59 }
  0x49   :  { %v368_v32 = vadd.s32 4294967240, %v1034_v59  ;;  %v375_v1 = vadd.s32 4294967232, %v1034_v59 }
  0x4a   :  { %157 = vadd.xlane.f32.xlu1 %v872_v3  ;;  %v326_v3 = vadd.s32 4294967288, %v1034_v59  ;;  %v1056_v47 = vsub.s32 %v340_v40, %v1036_v60  ;;  %v1120_v34 = vsub.s32 %v347_v22, %v1036_v60 }
  0x4b   :  { %247 = vadd.xlane.f32.xlu0 %v875_v4 }
  0x4e   :  { %250 = vadd.xlane.f32.xlu1 %v878_v5 }
  0x4f   :  { %205 = vadd.xlane.f32.xlu0 %v888_v9  ;;  %v333_v9 = vadd.s32 4294967280, %v1034_v59 }
  0x52   :  { %208 = vadd.xlane.f32.xlu1 %v891_v10  ;;  %v324_v10 = vsub.s32 %v1034_v59, %v1036_v60 }
  0x53   :  { %160 = vadd.xlane.f32.xlu0 %v902_v15  ;;  %v329_v15 = vsub.s32 %v326_v3, %v1036_v60  ;;  %v382_v3 = vadd.s32 4294967224, %v1034_v59 }
  0x56   :  { %163 = vadd.xlane.f32.xlu1 %v908_v19 }
  0x57   :  { %253 = vadd.xlane.f32.xlu0 %v911_v20 }
  0x5a   :  { %256 = vadd.xlane.f32.xlu1 %v916_v23  ;;  %v1044_v23 = vsub.s32 %v333_v9, %v1036_v60  ;;  %v396_v9 = vadd.s32 4294967208, %v1034_v59 }
  0x5b   :  { %211 = vadd.xlane.f32.xlu0 %v919_v24 }
  0x5e   :  { %214 = vadd.xlane.f32.xlu1 %v922_v25 }
  0x5f   :  { %166 = vadd.xlane.f32.xlu0 %v928_v29 }
  0x62   :  { %262 = vadd.xlane.f32.xlu1 %v940_v33 }
  0x63   :  { %259 = vadd.xlane.f32.xlu0 %v931_v30 }
  0x93   :  { %v170_v4 = vpop.xlane.xlu1 %169 }
  0x94   :  { %v122_v5 = vpop.xlane.xlu0 %121  ;;  %v434_v24 = vrot.slane %v170_v4, %v324_v10  ;;  %v1125_v4 = vsub.s32 %v354_v26, %v1036_v60 }
  0x95   :  { %v325_v25 = vrot.slane %v122_v5, %v324_v10  ;;  %v389_v5 = vadd.s32 4294967216, %v1034_v59 }
  0x97   :  { %v173_v19 = vpop.xlane.xlu1 %172 }
  0x98   :  { %v125_v20 = vpop.xlane.xlu0 %124  ;;  %v438_v29 = vrot.slane %v173_v19, %v329_v15  ;;  %v1134_v19 = vsub.s32 %v361_v31, %v1036_v60 }
  0x99   :  { %v330_v30 = vrot.slane %v125_v20, %v329_v15  ;;  %v403_v20 = vadd.s32 4294967200, %v1034_v59 }
  0x9a   :  { %v439_v33 = vsel %vm331_vm1, %v438_v29, %v434_v24  ;;  %v1138_v24 = vsub.s32 %v368_v32, %v1036_v60  ;;  %v417_v29 = vadd.s32 4294967184, %v1034_v59 }
  0x9b   :  { %v332_v35 = vsel %vm331_vm1, %v330_v30, %v325_v25  ;;  %v176_v36 = vpop.xlane.xlu1 %175  ;;  %v410_v25 = vadd.s32 4294967192, %v1034_v59  ;;  %v424_v30 = vadd.s32 4294967176, %v1034_v59 }
  0x9c   :  { %v128_v37 = vpop.xlane.xlu0 %127  ;;  %v443_v38 = vrot.slane %v176_v36, %v1044_v23 }
  0x9d   :  { %v337_v39 = vrot.slane %v128_v37, %v1044_v23  ;;  %v1152_v37 = vsub.s32 %v389_v5, %v1036_v60 }
  0x9e   :  { %v1052_v41 = vsel %vm338_vm2, %v443_v38, %v439_v33  ;;  %v1144_v33 = vsub.s32 %v375_v1, %v1036_v60  ;;  %v1155_v38 = vsub.s32 %v396_v9, %v1036_v60 }
  0x9f   :  { %v339_v42 = vsel %vm338_vm2, %v337_v39, %v332_v35  ;;  %v221_v43 = vpop.xlane.xlu1 %220  ;;  %v1147_v35 = vsub.s32 %v382_v3, %v1036_v60 }
  0xa0   :  { %v218_v44 = vpop.xlane.xlu0 %217  ;;  %v517_v45 = vrot.slane %v221_v43, %v329_v15 }
  0xa1   :  { %v513_v46 = vrot.slane %v218_v44, %v324_v10 }
  0xa3   :  { %v1059_v48 = vsel %vm331_vm1, %v517_v45, %v513_v46  ;;  %v1061_v49 = vpop.xlane.xlu1 %178  ;;  %v1168_v45 = vsub.s32 %v403_v20, %v1036_v60  ;;  %vm591_vm1 = vcmask 1042434  }
  0xa4   :  { %v131_v50 = vpop.xlane.xlu0 %130  ;;  %v448_v36 = vrot.slane %v1061_v49, %v1056_v47  ;;  %v1173_v49 = vsub.s32 %v410_v25, %v1036_v60 }
  0xa5   :  { %v344_v51 = vrot.slane %v131_v50, %v1056_v47  ;;  %v1176_v50 = vsub.s32 %v417_v29, %v1036_v60 }
  0xa7   :  { %v1065_v52 = vsel %vm345_vm3, %v344_v51, %v339_v42  ;;  %v1067_v53 = vpop.xlane.xlu1 %133  ;;  %v1179_v51 = vsub.s32 %v424_v30, %v1036_v60 }
  0xa8   :  { %v1069_v54 = vpop.xlane.xlu0 %223  ;;  %v351_v42 = vrot.slane %v1067_v53, %v1120_v34 }
  0xa9   :  { %v522_v43 = vrot.slane %v1069_v54, %v1044_v23 }
  0xab   :  { %v1071_v55 = vpop.xlane.xlu1 %226  ;;  %v523_v31 = vsel %vm338_vm2, %v522_v43, %v1059_v48 }
  0xac   :  { %v1073_v56 = vpop.xlane.xlu0 %181  ;;  %v527_v23 = vrot.slane %v1071_v55, %v1056_v47 }
  0xad   :  { %v453_v44 = vrot.slane %v1073_v56, %v1120_v34  ;;  %v267_v56 = vmul.u32 128, %v1036_v60 }
  0xae   :  { %v528_v48 = vsel %vm345_vm3, %v527_v23, %v523_v31 }
  0xaf   :  { %v1075_v57 = vpop.xlane.xlu1 %184 }
  0xb0   :  { %v1077_v58 = vpop.xlane.xlu0 %136  ;;  %v458_v46 = vrot.slane %v1075_v57, %v1125_v4  ;;  %v449_v57 = vsel %vm345_vm3, %v448_v36, %v1052_v41  ;;  %vm596_vm3 = vcmask 1042432  }
  0xb1   :  { %v358_v53 = vrot.slane %v1077_v58, %v1125_v4  ;;  %v454_v32 = vsel %vm352_vm4, %v453_v44, %v449_v57 }
  0xb3   :  { %v1079_v61 = vpop.xlane.xlu1 %139 }
  0xb4   :  { %v1081_v62 = vpop.xlane.xlu0 %229  ;;  %v365_v22 = vrot.slane %v1079_v61, %v1134_v19  ;;  %v459_v61 = vsel %vm359_vm5, %v458_v46, %v454_v32 }
  0xb5   :  { %v532_v26 = vrot.slane %v1081_v62, %v1120_v34 }
  0xb7   :  { %v1083_v63 = vpop.xlane.xlu1 %232 }
  0xb8   :  { %v1085_v0 = vpop.xlane.xlu0 %187  ;;  %v537_v62 = vrot.slane %v1083_v63, %v1125_v4  ;;  %v533_v63 = vsel %vm352_vm4, %v532_v26, %v528_v48 }
  0xb9   :  { %v463_v54 = vrot.slane %v1085_v0, %v1134_v19  ;;  %v353_v0 = vsel %vm352_vm4, %v351_v42, %v1065_v52  ;;  %vm608_vm4 = vcmask 0  }
  0xba   :  { %v360_v34 = vsel %vm359_vm5, %v358_v53, %v353_v0  ;;  %v538_v29 = vsel %vm359_vm5, %v537_v62, %v533_v63 }
  0xbb   :  { %v1087_v2 = vpop.xlane.xlu1 %190  ;;  %v464_v1 = vsel %vm366_vm6, %v463_v54, %v459_v61  ;;  %v367_v3 = vsel %vm366_vm6, %v365_v22, %v360_v34 }
  0xbc   :  { %v1089_v6 = vpop.xlane.xlu0 %142  ;;  %v468_v47 = vrot.slane %v1087_v2, %v1138_v24 }
  0xbd   :  { %v372_v41 = vrot.slane %v1089_v6, %v1138_v24 }
  0xbe   :  { %v469_v4 = vsel %vm373_vm7, %v468_v47, %v464_v1 }
  0xbf   :  { %v1091_v7 = vpop.xlane.xlu1 %145  ;;  %v374_v9 = vsel %vm373_vm7, %v372_v41, %v367_v3 }
  0xc0   :  { %v1093_v8 = vpop.xlane.xlu0 %235  ;;  %v379_v2 = vrot.slane %v1091_v7, %v1144_v33 }
  0xc1   :  { %v542_v20 = vrot.slane %v1093_v8, %v1134_v19 }
  0xc2   :  { %v381_v30 = vsel %vm380_vm8, %v379_v2, %v374_v9 }
  0xc3   :  { %v1095_v11 = vpop.xlane.xlu1 %238 }
  0xc4   :  { %v1097_v12 = vpop.xlane.xlu0 %193  ;;  %v547_v42 = vrot.slane %v1095_v11, %v1138_v24  ;;  %v543_v24 = vsel %vm366_vm6, %v542_v20, %v538_v29 }
  0xc5   :  { %v473_v52 = vrot.slane %v1097_v12, %v1144_v33 }
  0xc6   :  { %v548_v54 = vsel %vm373_vm7, %v547_v42, %v543_v24 }
  0xc7   :  { %v1099_v13 = vpop.xlane.xlu1 %196 }
  0xc8   :  { %v1101_v14 = vpop.xlane.xlu0 %148  ;;  %v478_v6 = vrot.slane %v1099_v13, %v1147_v35 }
  0xc9   :  { %v386_v7 = vrot.slane %v1101_v14, %v1147_v35  ;;  %v474_v14 = vsel %vm380_vm8, %v473_v52, %v469_v4 }
  0xca   :  { %v479_v8 = vsel %vm387_vm9, %v478_v6, %v474_v14 }
  0xcb   :  { %v1103_v16 = vpop.xlane.xlu1 %151  ;;  %v388_v19 = vsel %vm387_vm9, %v386_v7, %v381_v30 }
  0xcc   :  { %v1105_v17 = vpop.xlane.xlu0 %241  ;;  %v393_v13 = vrot.slane %v1103_v16, %v1152_v37 }
  0xcd   :  { %v552_v43 = vrot.slane %v1105_v17, %v1144_v33 }
  0xce   :  { %v395_v23 = vsel %vm394_vm10, %v393_v13, %v388_v19 }
  0xcf   :  { %v1107_v18 = vpop.xlane.xlu1 %244  ;;  %v553_v47 = vsel %vm380_vm8, %v552_v43, %v548_v54 }
  0xd0   :  { %v1109_v21 = vpop.xlane.xlu0 %199  ;;  %v557_v53 = vrot.slane %v1107_v18, %v1147_v35 }
  0xd1   :  { %v483_v25 = vrot.slane %v1109_v21, %v1152_v37 }
  0xd3   :  { %v1113_v27 = vpop.xlane.xlu1 %202 }
  0xd4   :  { %v1115_v28 = vpop.xlane.xlu0 %154  ;;  %v488_v36 = vrot.slane %v1113_v27, %v1155_v38 }
  0xd5   :  { %v400_v16 = vrot.slane %v1115_v28, %v1155_v38  ;;  %v484_v28 = vsel %vm394_vm10, %v483_v25, %v479_v8 }
  0xd6   :  { %v489_v17 = vsel %vm401_vm11, %v488_v36, %v484_v28 }
  0xd7   :  { %v1129_v10 = vpop.xlane.xlu1 %157  ;;  %v402_v57 = vsel %vm401_vm11, %v400_v16, %v395_v23 }
  0xd8   :  { %v1131_v15 = vpop.xlane.xlu0 %247  ;;  %v407_v44 = vrot.slane %v1129_v10, %v1168_v45 }
  0xd9   :  { %v562_v22 = vrot.slane %v1131_v15, %v1152_v37  ;;  %v558_v37 = vsel %vm387_vm9, %v557_v53, %v553_v47 }
  0xdb   :  { %v1157_v39 = vpop.xlane.xlu1 %250 }
  0xdc   :  { %v1159_v40 = vpop.xlane.xlu0 %205  ;;  %v567_v18 = vrot.slane %v1157_v39, %v1155_v38  ;;  %v563_v39 = vsel %vm394_vm10, %v562_v22, %v558_v37 }
  0xdd   :  { %v493_v21 = vrot.slane %v1159_v40, %v1168_v45 }
  0xde   :  { %v568_v48 = vsel %vm401_vm11, %v567_v18, %v563_v39 }
  0xdf   :  { %v209_v55 = vpop.xlane.xlu1 %208  ;;  %v494_v26 = vsel %vm408_vm12, %v493_v21, %v489_v17 }
  0xe0   :  { %v161_v58 = vpop.xlane.xlu0 %160  ;;  %v498_v27 = vrot.slane %v209_v55, %v1173_v49  ;;  %v409_v55 = vsel %vm408_vm12, %v407_v44, %v402_v57 }
  0xe1   :  { %v414_v40 = vrot.slane %v161_v58, %v1173_v49 }
  0xe2   :  { %v499_v35 = vsel %vm415_vm13, %v498_v27, %v494_v26 }
  0xe3   :  { %v164_v12 = vpop.xlane.xlu1 %163  ;;  %v416_v31 = vsel %vm415_vm13, %v414_v40, %v409_v55 }
  0xe4   :  { %v254_v5 = vpop.xlane.xlu0 %253  ;;  %v421_v33 = vrot.slane %v164_v12, %v1176_v50 }
  0xe5   :  { %v572_v32 = vrot.slane %v254_v5, %v1168_v45  ;;  %v272_v45 = vadd.s32 %v1034_v59, %v267_v56 }
  0xe6   :  { %v423_v61 = vsel %vm422_vm14, %v421_v33, %v416_v31 }
  0xe7   :  { %v257_v46 = vpop.xlane.xlu1 %256  ;;  %vm273_vm2 = vcmp.lt.s32.totalorder %v272_v45, 300 }
  0xe8   :  { %v212_v11 = vpop.xlane.xlu0 %211  ;;  %v577_v62 = vrot.slane %v257_v46, %v1173_v49  ;;  %v573_v49 = vsel %vm408_vm12, %v572_v32, %v568_v48 }
  0xe9   :  { %v503_v10 = vrot.slane %v212_v11, %v1176_v50 }
  0xea   :  { %v578_v4 = vsel %vm415_vm13, %v577_v62, %v573_v49 }
  0xeb   :  { %v215_v58 = vpop.xlane.xlu1 %214  ;;  %v504_v38 = vsel %vm422_vm14, %v503_v10, %v499_v35 }
  0xec   :  { %v167_v0 = vpop.xlane.xlu0 %166  ;;  %v508_v41 = vrot.slane %v215_v58, %v1179_v51 }
  0xed   :  { %v428_v15 = vrot.slane %v167_v0, %v1179_v51 }
  0xee   :  { %v509_v2 = vsel %vm429_vm15, %v508_v41, %v504_v38 }
  0xef   :  { %v430_v52 = vsel %vm429_vm15, %v428_v15, %v423_v61  ;;  %v263_v1 = vpop.xlane.xlu1 %262 }
  0xf0   :  { %v260_v34 = vpop.xlane.xlu0 %259  ;;  %v590_v6 = vsel %vm589_vm0, %v509_v2, %v430_v52  ;;  %v587_v63 = vrot.slane %v263_v1, %v1179_v51 }
  0xf1   :  { %v582_v3 = vrot.slane %v260_v34, %v1176_v50 }
  0xf3   :  { %v583_v7 = vsel %vm422_vm14, %v582_v3, %v578_v4 }
  0xf4   :  { %v588_v59 = vsel %vm429_vm15, %v587_v63, %v583_v7 }
  0xf5   :  { %v592_v60 = vsel %vm591_vm1, %v588_v59, %v590_v6 }
  0xf6   :  { %v594_v56 = vsel %vm273_vm2, %v592_v60, -inf }
  0xf7   :  { %v597_v12 = vsel %vm596_vm3, %v594_v56, -inf  ;;  %595 = vst [vmem:[%s1319_s2] sm:$0x7] %v594_v56  ;;  %s714_s2 = smov [#allocation2]  }
  0xf8   :  { %598 = vmax.xlane.f32.xlu0 %v597_v12  ;;  %s633_s7 = sshll.u32 %s714_s2, 4  ;;  %s634_s7 = int_to_ptr.vmem [resolvable:$true] %s633_s7 }
  0xf9   :  { %s666_s8 = scalar_lea.vmem %s634_s7, 16  ;;  %s670_s9 = scalar_lea.vmem %s634_s7, 32 }
  0xfa   :  { %p667_p0 = scmp.ne.s32.totalorder %s634_s7, %s666_s8  ;;  %p671_p1 = scmp.lt.s32.totalorder %s634_s7, %s634_s7 }
  0xfb   :  { %p672_p2 = scmp.lt.s32.totalorder %s670_s9, %s666_s8 }
  0xfd   :  { %p673_p3 = por %p672_p2, %p671_p1 }
  0xff   :  { %p674_p4 = pnand %p673_p3, %p667_p0 }
 0x185   :  { %v599_v50 = vpop.xlane.xlu0 %598 }
 0x186   :  { %v600_v51 = vrot.slane %v599_v50, 4 }
 0x188   :  { %v601_v5 = vmax.f32 %v599_v50, %v600_v51 }
 0x18a   :  { %v602_v9 = vrot.slane %v601_v5, 2 }
 0x18c   :  { %v603_v20 = vmax.f32 %v601_v5, %v602_v9 }
 0x18e   :  { %v604_v13 = vrot.slane %v603_v20, 1 }
 0x190   :  { %v605_v25 = vmax.f32 %v603_v20, %v604_v13 }
 0x192   :  { %658 = vpush %v605_v25 }
 0x1c3   :  { %s659_s6 = spop %658 }
 0x1c4   :  { %v607_v29 = vstv %s659_s6 }
 0x1c5   :  { %v610_v30 = vsub.f32 %v594_v56, %v607_v29  ;;  %609 = vst.msk [vmem:[#allocation2] sm:$0x1] %vm608_vm4, %v607_v29 }
 0x1c7   :  { %v611_v14 = vmul.f32 1.442695, %v610_v30 }
 0x1c9   :  { %664 = vpow2.f32 %v611_v14 }
 0x1d3   :  { %v665_v36 = vpop.eup %664 }
 0x1d4   :  { %v613_v42 = vsel %vm596_vm3, %v665_v36, 0.0 }
 0x1d5   :  { %614 = vadd.xlane.f32.xlu1 %v613_v42 }
 0x1d6   :  { %677 = shalt.err (!%p674_p4)
}
 0x1d7   :  { %s678_s12 = scalar_lea.hbm %s1320_s3, 16 }
 0x1d8   :  { %p679_p5 = scmp.ne.s32.totalorder %s1320_s3, %s678_s12  ;;  %p682_p6 = scmp.lt.u32.totalorder %s678_s12, %s1320_s3 }
 0x1da   :  { %p684_p7 = pnand %p682_p6, %p679_p5 }
 0x1dc   :  { %687 = shalt.err (!%p684_p7)
}
 0x1dd   :  { %636 = dma.vmem_to_hbm [thread:$0]  %s634_s7, 16, %s1320_s3, [#allocation3]  }
 0x1de   :  { %s715_s19 = smov [#allocation4]  }
 0x1df   :  { %s643_s20 = sshll.u32 %s715_s19, 4  ;;  %s644_s20 = int_to_ptr.vmem [resolvable:$true] %s643_s20 }
 0x1e0   :  { %s688_s22 = scalar_lea.vmem %s644_s20, 16  ;;  %s692_s23 = scalar_lea.vmem %s644_s20, 32 }
 0x1e1   :  { %p689_p8 = scmp.ne.s32.totalorder %s644_s20, %s688_s22  ;;  %p693_p9 = scmp.lt.s32.totalorder %s644_s20, %s644_s20 }
 0x1e2   :  { %p694_p10 = scmp.lt.s32.totalorder %s692_s23, %s688_s22 }
 0x1e4   :  { %p695_p11 = por %p694_p10, %p693_p9 }
 0x1e6   :  { %p696_p12 = pnand %p695_p11, %p689_p8 }
 0x262   :  { %v615_v8 = vpop.xlane.xlu1 %614 }
 0x263   :  { %v616_v16 = vrot.slane %v615_v8, 4 }
 0x265   :  { %v617_v21 = vadd.f32 %v616_v16, %v615_v8 }
 0x267   :  { %v618_v19 = vrot.slane %v617_v21, 2 }
 0x269   :  { %v619_v43 = vadd.f32 %v618_v19, %v617_v21 }
 0x26b   :  { %v620_v44 = vrot.slane %v619_v43, 1 }
 0x26d   :  { %v621_v27 = vadd.f32 %v620_v44, %v619_v43 }
 0x26f   :  { %660 = vpush %v621_v27 }
 0x2a0   :  { %s661_s21 = spop %660 }
 0x2a1   :  { %v623_v46 = vstv %s661_s21 }
 0x2a2   :  { %624 = vst.msk [vmem:[#allocation4] sm:$0x1] %vm608_vm4, %v623_v46 }
 0x2a3   :  { %699 = shalt.err (!%p696_p12)
}
 0x2a4   :  { %s700_s1 = scalar_lea.hbm %s1321_s4, 16 }
 0x2a5   :  { %p701_p13 = scmp.ne.s32.totalorder %s1321_s4, %s700_s1  ;;  %p704_p0 = scmp.lt.u32.totalorder %s700_s1, %s1321_s4 }
 0x2a7   :  { %p706_p1 = pnand %p704_p0, %p701_p13 }
 0x2a9   :  { %709 = shalt.err (!%p706_p1)
}
 0x2aa   :  { %646 = dma.vmem_to_hbm [thread:$0]  %s644_s20, 16, %s1321_s4, [#allocation5]  }
 0x2ab   :  { %710 = dma.done.wait [#allocation3], 16  }
 0x2ac   :  { %711 = vsyncadd [#allocation3], 4294967280 }
 0x2ad   :  { %712 = dma.done.wait [#allocation5], 16  }
 0x2ae   :  { %713 = vsyncadd [#allocation5], 4294967280 }
 0x2af   :  { %655 = vsyncpa [#allocation3], 1 }
 0x2b0   :  { %656 = vsyncpa [#allocation5], 1 }

</bundles_post_ra>
